<compile_context>
chip_gen: v6e
topology: v6e:2x2x1
jax: 0.10.0
libtpu: 0.0.40
codegen_flags: <defaults>
</compile_context>

<pallas_src>
import jax
import jax.numpy as jnp
from jax.experimental import pallas as pl
from jax.experimental.pallas import tpu as pltpu


def _starrelu_kernel(x_ref, scale_ref, bias_ref, o_ref):
    # x_ref/o_ref: (block_rows, lane) VMEM tiles; scale_ref/bias_ref: (1,) SMEM.
    s = scale_ref[0]
    b = bias_ref[0]
    x = x_ref[...].astype(jnp.float32)
    r = jnp.maximum(x, 0.0)
    o_ref[...] = (r * r * s + b).astype(o_ref.dtype)


def _device_kind() -> str:
    try:
        return jax.devices()[0].device_kind.lower()
    except Exception:
        return ""


def starrelu(x, scale, bias):
    """StarReLU: scale * relu(x)**2 + bias, with scalar (shape (1,)) scale/bias."""
    orig_shape = x.shape
    out_dtype = x.dtype
    total = int(x.size)

    scale_s = jnp.asarray(scale, jnp.float32).reshape(1)
    bias_s = jnp.asarray(bias, jnp.float32).reshape(1)

    if total == 0:
        return x

    # ---- chip-aware knobs --------------------------------------------------
    kind = _device_kind()
    is_dual_tc = ("v7" in kind) or ("tpu7" in kind)          # v7x: 2 TCs, 3.2 TB/s HBM
    target_block_bytes = (8 if is_dual_tc else 4) * 1024 * 1024
    vmem_limit = (48 if is_dual_tc else 32) * 1024 * 1024

    itemsize = jnp.dtype(out_dtype).itemsize
    sublane = max(8, 32 // max(1, itemsize))                  # 8 f32 / 16 bf16 / 32 int8

    # ---- lane-dense 2-D view (no full-tensor pad/slice) ---------------------
    lane = 128
    for cand in (1024, 512, 256, 128):
        if total % cand == 0:
            lane = cand
            break
    rows = total // lane
    rem = total - rows * lane                                  # 0 <= rem < 128

    xf = x.reshape(-1)                                         # contiguous flatten (bitcast)

    if rows == 0:
        # Whole input smaller than one lane row: one fused XLA elementwise op.
        rf = jnp.maximum(xf.astype(jnp.float32), 0.0)
        return (rf * rf * scale_s[0] + bias_s[0]).astype(out_dtype).reshape(orig_shape)

    # ---- byte-budgeted, dtype-aware block sizing ----------------------------
    if rows <= sublane:
        block_rows = rows                                      # full-extent block (legal)
    else:
        target_rows = max(sublane, target_block_bytes // (lane * itemsize))
        block_rows = min(target_rows, rows)
        block_rows = max(sublane, (block_rows // sublane) * sublane)
    grid_rows = pl.cdiv(rows, block_rows)

    # Dual-TC chips: ensure >= 2 pipelined steps per core (>= 4 total) when the
    # input is big enough; single-TC chips keep the minimal grid.
    if is_dual_tc and grid_rows < 4 and rows >= 4 * sublane:
        block_rows = (((rows + 3) // 4) + sublane - 1) // sublane * sublane
        block_rows = max(sublane, block_rows)
        grid_rows = pl.cdiv(rows, block_rows)

    # Aligned prefix only; remainder handled outside the kernel (tiny).
    x_main = xf if rem == 0 else jax.lax.slice(xf, (0,), (rows * lane,))
    x2 = x_main.reshape(rows, lane)

    out2 = pl.pallas_call(
        _starrelu_kernel,
        out_shape=jax.ShapeDtypeStruct((rows, lane), out_dtype),
        grid=(grid_rows,),
        in_specs=[
            pl.BlockSpec((block_rows, lane), lambda i: (i, 0)),
            pl.BlockSpec(memory_space=pltpu.MemorySpace.SMEM),
            pl.BlockSpec(memory_space=pltpu.MemorySpace.SMEM),
        ],
        out_specs=pl.BlockSpec((block_rows, lane), lambda i: (i, 0)),
        compiler_params=pltpu.CompilerParams(
            dimension_semantics=("parallel",),
            vmem_limit_bytes=vmem_limit,
        ),
    )(x2, scale_s, bias_s)

    out_flat = out2.reshape(-1)
    if rem:
        tail = jax.lax.slice(xf, (rows * lane,), (total,))     # <128 elements
        rt = jnp.maximum(tail.astype(jnp.float32), 0.0)
        tail_out = (rt * rt * scale_s[0] + bias_s[0]).astype(out_dtype)
        out_flat = jnp.concatenate([out_flat, tail_out])
    return out_flat.reshape(orig_shape)


def starrelu_ref(x, scale, bias):
    r = jnp.maximum(x, 0.0)
    return scale * (r ** 2) + bias


if __name__ == "__main__":
    key = jax.random.PRNGKey(0)
    kx, ks, kb, k2, k3 = jax.random.split(key, 5)

    # Learnable scalars (module init: scale=1.0, bias=0.0; perturbed slightly
    # so the check is non-trivial).
    scale = 1.0 + 0.1 * jax.random.normal(ks, (1,), dtype=jnp.float32)
    bias = 0.0 + 0.1 * jax.random.normal(kb, (1,), dtype=jnp.float32)

    # Small NCHW activation, as the module would see from a conv stage.
    x = jax.random.normal(kx, (2, 4, 16, 16), dtype=jnp.float32)
    out = jax.block_until_ready(starrelu(x, scale, bias))
    ref = starrelu_ref(x, scale, bias)
    assert out.shape == x.shape
    assert jnp.allclose(out, ref, atol=1e-5, rtol=1e-5), float(jnp.max(jnp.abs(out - ref)))

    # Larger shape exercising the tiled / multi-step path.
    x_big = jax.random.normal(k2, (4, 32, 64, 64), dtype=jnp.float32)
    out_big = jax.block_until_ready(starrelu(x_big, scale, bias))
    ref_big = starrelu_ref(x_big, scale, bias)
    assert jnp.allclose(out_big, ref_big, atol=1e-5, rtol=1e-5)

    # Odd element count (210): exercises the aligned-prefix + jnp-tail path
    # (no full-tensor pad/slice).
    x_odd = jax.random.normal(k3, (2, 3, 7, 5), dtype=jnp.float32)
    out_odd = jax.block_until_ready(starrelu(x_odd, scale, bias))
    ref_odd = starrelu_ref(x_odd, scale, bias)
    assert jnp.allclose(out_odd, ref_odd, atol=1e-5, rtol=1e-5)

    # bf16 path: exercises dtype-aware (16-row sublane) block sizing.
    x_bf16 = jax.random.normal(kx, (2, 8, 32, 32), dtype=jnp.bfloat16)
    out_bf16 = jax.block_until_ready(starrelu(x_bf16, scale, bias))
    ref_bf16 = starrelu_ref(x_bf16.astype(jnp.float32), scale, bias).astype(jnp.bfloat16)
    assert jnp.allclose(out_bf16.astype(jnp.float32), ref_bf16.astype(jnp.float32),
                        atol=2e-2, rtol=2e-2)

    print("KERNEL_OK")
</pallas_src>

<mosaic_0001>
module attributes {stable_mosaic.version = 11 : i64} {
  func.func @_starrelu_kernel(%arg0: i32, %arg1: memref<2x1024xf32, #tpu.memory_space<vmem>>, %arg2: memref<1xf32, #tpu.memory_space<smem>>, %arg3: memref<1xf32, #tpu.memory_space<smem>>, %arg4: memref<2x1024xf32, #tpu.memory_space<vmem>>) attributes {dimension_semantics = [#tpu.dimension_semantics<parallel>], iteration_bounds = array<i64: 1>, scalar_prefetch = 0 : i64, scratch_operands = 0 : i64, tpu.core_type = #tpu.core_type<tc>, window_params = [{transform_indices = @transform_0, window_bounds = array<i64: 2, 1024>}, {transform_indices = @transform_1, window_bounds = array<i64: 1>}, {transform_indices = @transform_2, window_bounds = array<i64: 1>}, {transform_indices = @transform_3, window_bounds = array<i64: 2, 1024>}]} {
    %c0 = arith.constant 0 : index
    %0 = memref.load %arg2[%c0] : memref<1xf32, #tpu.memory_space<smem>>
    %c0_0 = arith.constant 0 : index
    %1 = memref.load %arg3[%c0_0] : memref<1xf32, #tpu.memory_space<smem>>
    %c0_1 = arith.constant 0 : index
    %c0_2 = arith.constant 0 : index
    %2 = vector.load %arg1[%c0_1, %c0_2] : memref<2x1024xf32, #tpu.memory_space<vmem>>, vector<2x1024xf32>
    %cst = arith.constant 0.000000e+00 : f32
    %3 = vector.broadcast %cst : f32 to vector<2x1024xf32>
    %4 = arith.maximumf %2, %3 : vector<2x1024xf32>
    %5 = arith.mulf %4, %4 : vector<2x1024xf32>
    %6 = vector.broadcast %0 : f32 to vector<2x1024xf32>
    %7 = arith.mulf %5, %6 : vector<2x1024xf32>
    %8 = vector.broadcast %1 : f32 to vector<2x1024xf32>
    %9 = arith.addf %7, %8 : vector<2x1024xf32>
    %c0_3 = arith.constant 0 : index
    %c0_4 = arith.constant 0 : index
    %10 = vector.load %arg4[%c0_3, %c0_4] : memref<2x1024xf32, #tpu.memory_space<vmem>>, vector<2x1024xf32>
    tpu.vector_store %arg4[%c0_3, %c0_4], %9 {strides = array<i32>} : memref<2x1024xf32, #tpu.memory_space<vmem>>, vector<2x1024xf32>,
    return
  }
  func.func @transform_0(%arg0: i32) -> (i32, i32) {
    %c0_i32 = arith.constant 0 : i32
    %c0_i32_0 = arith.constant 0 : i32
    return %arg0, %c0_i32 : i32, i32
  }
  func.func @transform_1(%arg0: i32) -> i32 {
    %c0_i32 = arith.constant 0 : i32
    %c0_i32_0 = arith.constant 0 : i32
    return %c0_i32 : i32
  }
  func.func @transform_2(%arg0: i32) -> i32 {
    %c0_i32 = arith.constant 0 : i32
    %c0_i32_0 = arith.constant 0 : i32
    return %c0_i32 : i32
  }
  func.func @transform_3(%arg0: i32) -> (i32, i32) {
    %c0_i32 = arith.constant 0 : i32
    %c0_i32_0 = arith.constant 0 : i32
    return %arg0, %c0_i32 : i32, i32
  }
}

</mosaic_0001>

<bundles_post_ra>
// kernel: tpu_custom_call.1
= control target key start
LH: loop header
LB: loop body
LE: loop exit
PB: predicated region body
PF: predicated region fallthrough
CT: control target
= control target key end

     0   :  { %10 = vsyncpa [#allocation5], 0  ;;  %s140_s0 = inlined_call_operand.hbm [shape: f32[2,1024], index: 0, kind: input, shape index: {}]   ;;  %s141_s1 = inlined_call_operand.<no memory space> [shape: f32[1], index: 1, kind: input, shape index: {}]   ;;  %s142_s2 = inlined_call_operand.<no memory space> [shape: f32[1], index: 2, kind: input, shape index: {}]   ;;  %s143_s3 = inlined_call_operand.hbm [shape: f32[2,1024], index: 3, kind: output, shape index: {}]  }
   0x1   :  { %11 = vsyncpa [#allocation6], 0  ;;  %s106_s12 = smov [#allocation4]  }
   0x2   :  { %s18_s13 = sshll.u32 %s106_s12, 4  ;;  %s19_s13 = int_to_ptr.vmem [resolvable:$true] %s18_s13 }
   0x3   :  { %s70_s14 = scalar_lea.vmem %s19_s13, 256  ;;  %p75_p1 = scmp.lt.s32.totalorder %s19_s13, %s19_s13 }
   0x4   :  { %p71_p0 = scmp.ne.s32.totalorder %s19_s13, %s70_s14  ;;  %p76_p2 = scmp.lt.s32.totalorder %s70_s14, %s70_s14 }
   0x6   :  { %p77_p3 = por %p76_p2, %p75_p1 }
   0x8   :  { %p78_p4 = pnand %p77_p3, %p71_p0 }
   0xa   :  { %81 = shalt.err (!%p78_p4)
}
   0xb   :  { %21 = dma.hbm_to_vmem [thread:$0]  %s140_s0, 256, %s19_s13, [#allocation5]  }
   0xc   :  { %102 = dma.done.wait [#allocation5], 256  }
   0xd   :  { %103 = vsyncadd [#allocation5], 4294967040  ;;  %v31_v0 = vld [vmem:[#allocation4] sm:$0xff]  ;;  %v32_v1 = vld [vmem:[#allocation4 + $0x8] sm:$0xff]  ;;  %v37_v4 = vstv %s141_s1  ;;  %v40_v7 = vstv %s142_s2  ;;  %s107_s21 = smov [#allocation7]  }
   0xe   :  { %v33_v2 = vmax.f32 %v31_v0, 0.0  ;;  %v34_v3 = vmax.f32 %v32_v1, 0.0  ;;  %s51_s22 = sshll.u32 %s107_s21, 4  ;;  %s52_s22 = int_to_ptr.vmem [resolvable:$true] %s51_s22 }
   0xf   :  { %s82_s0 = scalar_lea.vmem %s52_s22, 256  ;;  %p87_p6 = scmp.lt.s32.totalorder %s52_s22, %s52_s22 }
  0x10   :  { %v35_v5 = vmul.f32 %v33_v2, %v33_v2  ;;  %v36_v6 = vmul.f32 %v34_v3, %v34_v3  ;;  %p83_p5 = scmp.ne.s32.totalorder %s52_s22, %s82_s0  ;;  %p88_p7 = scmp.lt.s32.totalorder %s82_s0, %s82_s0 }
  0x12   :  { %v38_v8 = vmul.f32 %v37_v4, %v35_v5  ;;  %v39_v9 = vmul.f32 %v37_v4, %v36_v6  ;;  %p89_p8 = por %p88_p7, %p87_p6 }
  0x14   :  { %v41_v10 = vadd.f32 %v40_v7, %v38_v8  ;;  %v42_v11 = vadd.f32 %v40_v7, %v39_v9  ;;  %p90_p9 = pnand %p89_p8, %p83_p5 }
  0x16   :  { %43 = vst [vmem:[#allocation7] sm:$0xff] %v41_v10  ;;  %44 = vst [vmem:[#allocation7 + $0x8] sm:$0xff] %v42_v11 }
  0x17   :  { %93 = shalt.err (!%p90_p9)
}
  0x18   :  { %54 = dma.vmem_to_hbm [thread:$0]  %s52_s22, 256, %s143_s3, [#allocation6]  }
  0x19   :  { %104 = dma.done.wait [#allocation6], 256  }
  0x1a   :  { %105 = vsyncadd [#allocation6], 4294967040 }
  0x1b   :  { %58 = vsyncpa [#allocation5], 1 }
  0x1c   :  { %59 = vsyncpa [#allocation6], 1 }

</bundles_post_ra>
